<compile_context>
chip_gen: v6e
topology: v6e:2x2x1
jax: 0.10.0
libtpu: 0.0.40
codegen_flags: <defaults>
</compile_context>

<pallas_src>
import functools
import math

import jax
import jax.numpy as jnp
from jax.experimental import pallas as pl
from jax.experimental.pallas import tpu as pltpu


# ----------------------------------------------------------------------------
# Kernel: TB batch elements per grid step, all projections + MHA fused.
# ----------------------------------------------------------------------------
def _slot_attn_kernel(*refs, num_heads, has_attn_mask, has_kpm):
    idx = 0
    am_ref = None
    kpm_ref = None
    if has_attn_mask:
        am_ref = refs[idx]; idx += 1
    if has_kpm:
        kpm_ref = refs[idx]; idx += 1
    (qcp_ref, kcp_ref, kc_ref,
     wq_ref, bq_ref, wk_ref, bk_ref, wv_ref, bv_ref,
     wo_ref, bo_ref, out_ref) = refs[idx:]

    f32 = jnp.float32
    bf16 = jnp.bfloat16

    TB, L, twoD = qcp_ref.shape            # static Python ints at trace time
    S = kc_ref.shape[1]
    D = out_ref.shape[2]
    hd = D // num_heads

    # ---- fused projections: one large-M matmul each (bf16 operands, f32 accum) ----
    qcp = qcp_ref[...].reshape(TB * L, twoD)
    kcp = kcp_ref[...].reshape(TB * S, twoD)
    kcf = kc_ref[...].reshape(TB * S, D)

    q = jnp.dot(qcp, wq_ref[...], preferred_element_type=f32) + bq_ref[...]  # scale folded
    k = jnp.dot(kcp, wk_ref[...], preferred_element_type=f32) + bk_ref[...]
    v = jnp.dot(kcf, wv_ref[...], preferred_element_type=f32) + bv_ref[...]

    q_all = q.reshape(TB, L, D).astype(bf16)
    k_all = k.reshape(TB, S, D).astype(bf16)
    v_all = v.reshape(TB, S, D).astype(bf16)

    wo = wo_ref[...]                                   # (D, D) bf16
    bo = bo_ref[...]                                   # (1, D) f32
    am = am_ref[...] if has_attn_mask else None        # (L, S) f32 additive
    kpm = kpm_ref[...] if has_kpm else None            # (TB, 1, S) f32 additive

    # ---- per-batch-element attention (TB is small and static) ---------------------
    for b in range(TB):
        qb = q_all[b]                                  # (L, D) bf16
        kb = k_all[b]                                  # (S, D)
        vb = v_all[b]                                  # (S, D)

        bias = None                                    # (., S) f32 additive
        if am is not None:
            bias = am
        if kpm is not None:
            row = kpm[b]                               # (1, S)
            bias = row if bias is None else bias + row

        acc = jnp.zeros((L, D), f32)
        for h in range(num_heads):
            sl = slice(h * hd, (h + 1) * hd)
            # scores = q_h @ k_h^T (contract last dims; softmax scale already in q)
            s = jax.lax.dot_general(qb[:, sl], kb[:, sl],
                                    (((1,), (1,)), ((), ())),
                                    preferred_element_type=f32)      # (L, S) f32
            if bias is not None:
                s = s + bias
            s = s - jnp.max(s, axis=-1, keepdims=True)
            p = jnp.exp(s)
            inv = pl.reciprocal(jnp.sum(p, axis=-1, keepdims=True), approx=True)
            p = (p * inv).astype(bf16)
            oh = jnp.dot(p, vb[:, sl], preferred_element_type=f32)   # (L, hd)
            # distribute W_o over heads: no lane-axis concatenate
            acc = acc + jnp.dot(oh.astype(bf16), wo[sl, :],
                                preferred_element_type=f32)          # (L, D)
        out_ref[b] = (acc + bo).astype(out_ref.dtype)


# ----------------------------------------------------------------------------
# Wrapper-side algebraic folding of the module Linears + MHA in_proj.
# ----------------------------------------------------------------------------
def _fuse_params(params, num_heads):
    p = {k: jnp.asarray(v, jnp.float32) for k, v in params.items()}
    D = p["qc_w"].shape[0]
    scale = 1.0 / math.sqrt(D // num_heads)
    wq = jnp.concatenate([p["qc_w"] @ p["in_q_w"], p["qp_w"] @ p["in_q_w"]], axis=0) * scale
    bq = ((p["qc_b"] + p["qp_b"]) @ p["in_q_w"] + p["in_q_b"]) * scale
    wk = jnp.concatenate([p["kc_w"] @ p["in_k_w"], p["kp_w"] @ p["in_k_w"]], axis=0)
    bk = (p["kc_b"] + p["kp_b"]) @ p["in_k_w"] + p["in_k_b"]
    wv = p["v_w"] @ p["in_v_w"]
    bv = p["v_b"] @ p["in_v_w"] + p["in_v_b"]
    return dict(
        wq=wq.astype(jnp.bfloat16), bq=bq,            # weights bf16, biases stay f32
        wk=wk.astype(jnp.bfloat16), bk=bk,
        wv=wv.astype(jnp.bfloat16), bv=bv,
        wo=p["out_w"].astype(jnp.bfloat16), bo=p["out_b"],
    )


def _pick_tb(batch, rows):
    """Batch elements per grid step: target ~256 projection rows, keep >= 2 steps."""
    cap = max(1, 256 // max(rows, 1))
    if batch >= 2:
        cap = min(cap, batch // 2)        # >= 2 grid steps -> both TensorCores (v7x)
    cap = max(cap, 1)
    tb = 1
    for t in range(1, cap + 1):
        if batch % t == 0:
            tb = t
    return tb


def slot_to_slot_attention(query_content, query_pos, key_content, key_pos,
                           params, num_heads,
                           attn_mask=None, key_padding_mask=None):
    """SlotToSlotAttention.forward.  Inputs seq-major like PyTorch:
    query_* (L, B, D), key_* (S, B, D).  Returns (L, B, D)."""
    L, B, D = query_content.shape
    S = key_content.shape[0]
    assert D % num_heads == 0

    tb = _pick_tb(B, max(L, S))
    grid = (B // tb,)

    # qc|qp / kc|kp feature-concat + batch-major transpose + bf16 cast (one pass each)
    qcp = jnp.transpose(jnp.concatenate([query_content, query_pos], axis=-1),
                        (1, 0, 2)).astype(jnp.bfloat16)            # (B, L, 2D)
    kcp = jnp.transpose(jnp.concatenate([key_content, key_pos], axis=-1),
                        (1, 0, 2)).astype(jnp.bfloat16)            # (B, S, 2D)
    kcb = jnp.transpose(key_content, (1, 0, 2)).astype(jnp.bfloat16)  # (B, S, D)

    fused = _fuse_params(params, num_heads)

    has_am = attn_mask is not None
    has_kpm = key_padding_mask is not None

    in_specs = []
    args = []
    if has_am:
        am = attn_mask
        if am.dtype == jnp.bool_:
            am = jnp.where(am, -1e9, 0.0)
        am = am.astype(jnp.float32)                                # (L, S) additive
        in_specs.append(pl.BlockSpec((L, S), lambda g: (0, 0)))
        args.append(am)
    if has_kpm:
        kpm = key_padding_mask
        if kpm.dtype == jnp.bool_:
            kpm = jnp.where(kpm, -1e9, 0.0)
        kpm = kpm.astype(jnp.float32).reshape(B, 1, S)             # (B, 1, S) additive
        in_specs.append(pl.BlockSpec((tb, 1, S), lambda g: (g, 0, 0)))
        args.append(kpm)

    in_specs += [
        pl.BlockSpec((tb, L, 2 * D), lambda g: (g, 0, 0)),   # qc|qp
        pl.BlockSpec((tb, S, 2 * D), lambda g: (g, 0, 0)),   # kc|kp
        pl.BlockSpec((tb, S, D), lambda g: (g, 0, 0)),       # kc (value input)
        pl.BlockSpec((2 * D, D), lambda g: (0, 0)),          # wq (fetched once)
        pl.BlockSpec((1, D), lambda g: (0, 0)),              # bq
        pl.BlockSpec((2 * D, D), lambda g: (0, 0)),          # wk
        pl.BlockSpec((1, D), lambda g: (0, 0)),              # bk
        pl.BlockSpec((D, D), lambda g: (0, 0)),              # wv
        pl.BlockSpec((1, D), lambda g: (0, 0)),              # bv
        pl.BlockSpec((D, D), lambda g: (0, 0)),              # wo
        pl.BlockSpec((1, D), lambda g: (0, 0)),              # bo
    ]
    args += [qcp, kcp, kcb,
             fused["wq"], fused["bq"], fused["wk"], fused["bk"],
             fused["wv"], fused["bv"], fused["wo"], fused["bo"]]

    # Advisory cost estimate + explicit VMEM budget.
    flops = 2 * B * (L * 2 * D * D + S * 2 * D * D + S * D * D   # projections
                     + 2 * L * S * D                             # scores + p@v
                     + L * D * D)                                 # out-proj
    transcendentals = B * num_heads * L * S
    bytes_accessed = int(sum(int(a.size) * a.dtype.itemsize for a in args)
                         + B * L * D * 4)
    block_bytes = (tb * (L * 2 * D + S * 2 * D + S * D) * 2       # bf16 activation blocks
                   + tb * L * D * 4                               # f32 output block
                   + (L * S + tb * S) * 4                         # masks
                   + (2 * (2 * D) * D + 2 * D * D) * 2            # bf16 weights
                   + 4 * D * 4)                                   # f32 biases
    vmem_limit = int(min(64 * 1024 * 1024, max(32 * 1024 * 1024, 6 * block_bytes)))

    kernel = functools.partial(_slot_attn_kernel, num_heads=num_heads,
                               has_attn_mask=has_am, has_kpm=has_kpm)

    out = pl.pallas_call(
        kernel,
        grid=grid,
        in_specs=in_specs,
        out_specs=pl.BlockSpec((tb, L, D), lambda g: (g, 0, 0)),
        out_shape=jax.ShapeDtypeStruct((B, L, D), jnp.float32),
        compiler_params=pltpu.CompilerParams(
            dimension_semantics=("parallel",),
            vmem_limit_bytes=vmem_limit),
        cost_estimate=pl.CostEstimate(flops=int(flops),
                                      transcendentals=int(transcendentals),
                                      bytes_accessed=bytes_accessed),
    )(*args)

    return jnp.transpose(out, (1, 0, 2))   # back to (L, B, D) == MHA output [0]


# ----------------------------------------------------------------------------
# Pure-JAX reference (unfused, mirrors the PyTorch math) for a sanity check
# ----------------------------------------------------------------------------
def _reference(query_content, query_pos, key_content, key_pos, params,
               num_heads, attn_mask=None, key_padding_mask=None):
    L, B, D = query_content.shape
    S = key_content.shape[0]
    hd = D // num_heads
    q = (query_content @ params["qc_w"] + params["qc_b"]
         + query_pos @ params["qp_w"] + params["qp_b"])
    k = (key_content @ params["kc_w"] + params["kc_b"]
         + key_pos @ params["kp_w"] + params["kp_b"])
    v = key_content @ params["v_w"] + params["v_b"]
    q = q @ params["in_q_w"] + params["in_q_b"]
    k = k @ params["in_k_w"] + params["in_k_b"]
    v = v @ params["in_v_w"] + params["in_v_b"]
    qh = q.reshape(L, B, num_heads, hd).transpose(1, 2, 0, 3)   # (B, H, L, hd)
    kh = k.reshape(S, B, num_heads, hd).transpose(1, 2, 0, 3)
    vh = v.reshape(S, B, num_heads, hd).transpose(1, 2, 0, 3)
    scores = jnp.einsum('bhld,bhsd->bhls', qh, kh) / math.sqrt(hd)
    if attn_mask is not None:
        am = jnp.where(attn_mask, -1e9, 0.0) if attn_mask.dtype == jnp.bool_ else attn_mask
        scores = scores + am[None, None]
    if key_padding_mask is not None:
        scores = scores + jnp.where(key_padding_mask, -1e9, 0.0)[:, None, None, :]
    p = jax.nn.softmax(scores, axis=-1)
    o = jnp.einsum('bhls,bhsd->bhld', p, vh).transpose(2, 0, 1, 3).reshape(L, B, D)
    return o @ params["out_w"] + params["out_b"]


# ----------------------------------------------------------------------------
# main
# ----------------------------------------------------------------------------
if __name__ == "__main__":
    L, S, B, D, H = 8, 8, 2, 32, 4          # slots (tgt), slots (src), batch, hidden, heads

    key = jax.random.PRNGKey(0)
    ks = iter(jax.random.split(key, 32))

    def linear_w(k, din, dout):             # nn.Linear-style bounded uniform (in, out) layout
        bound = 1.0 / math.sqrt(din)
        return jax.random.uniform(k, (din, dout), jnp.float32, -bound, bound)

    def linear_b(k, din, dout):
        bound = 1.0 / math.sqrt(din)
        return jax.random.uniform(k, (1, dout), jnp.float32, -bound, bound)

    def xavier(k, din, dout):               # MHA in_proj xavier_uniform
        bound = math.sqrt(6.0 / (din + dout))
        return jax.random.uniform(k, (din, dout), jnp.float32, -bound, bound)

    params = {
        # Attention.{query_content, query_pos, key_content, key_pos, value} = nn.Linear(D, D)
        "qc_w": linear_w(next(ks), D, D), "qc_b": linear_b(next(ks), D, D),
        "qp_w": linear_w(next(ks), D, D), "qp_b": linear_b(next(ks), D, D),
        "kc_w": linear_w(next(ks), D, D), "kc_b": linear_b(next(ks), D, D),
        "kp_w": linear_w(next(ks), D, D), "kp_b": linear_b(next(ks), D, D),
        "v_w":  linear_w(next(ks), D, D), "v_b":  linear_b(next(ks), D, D),
        # nn.MultiheadAttention(D, H): in_proj (xavier, zero bias) + out_proj (zero bias)
        "in_q_w": xavier(next(ks), D, D), "in_q_b": jnp.zeros((1, D), jnp.float32),
        "in_k_w": xavier(next(ks), D, D), "in_k_b": jnp.zeros((1, D), jnp.float32),
        "in_v_w": xavier(next(ks), D, D), "in_v_b": jnp.zeros((1, D), jnp.float32),
        "out_w": linear_w(next(ks), D, D), "out_b": jnp.zeros((1, D), jnp.float32),
    }

    query_content = jax.random.normal(next(ks), (L, B, D), jnp.float32)
    query_pos     = jax.random.normal(next(ks), (L, B, D), jnp.float32)
    key_content   = jax.random.normal(next(ks), (S, B, D), jnp.float32)
    key_pos       = jax.random.normal(next(ks), (S, B, D), jnp.float32)

    # exercise both mask paths: causal bool attn_mask + key_padding_mask (True = ignore)
    attn_mask = jnp.triu(jnp.ones((L, S), jnp.bool_), k=1)
    key_padding_mask = jnp.zeros((B, S), jnp.bool_).at[1, S - 1].set(True)

    out = slot_to_slot_attention(query_content, query_pos, key_content, key_pos,
                                 params, num_heads=H,
                                 attn_mask=attn_mask, key_padding_mask=key_padding_mask)
    out = jax.block_until_ready(out)

    ref = _reference(query_content, query_pos, key_content, key_pos, params,
                     H, attn_mask=attn_mask, key_padding_mask=key_padding_mask)

    assert out.shape == (L, B, D)
    assert bool(jnp.all(jnp.isfinite(out)))
    # bf16 matmul operands with f32 accumulation -> relaxed tolerance
    assert bool(jnp.allclose(out, ref, atol=1e-1, rtol=1e-1)), \
        float(jnp.max(jnp.abs(out - ref)))
    print("KERNEL_OK")
</pallas_src>

<mosaic_0001>
module attributes {stable_mosaic.version = 11 : i64} {
  func.func @_slot_attn_kernel(%arg0: i32, %arg1: memref<8x8xf32, #tpu.memory_space<vmem>>, %arg2: memref<1x1x8xf32, #tpu.memory_space<vmem>>, %arg3: memref<1x8x64xbf16, #tpu.memory_space<vmem>>, %arg4: memref<1x8x64xbf16, #tpu.memory_space<vmem>>, %arg5: memref<1x8x32xbf16, #tpu.memory_space<vmem>>, %arg6: memref<64x32xbf16, #tpu.memory_space<vmem>>, %arg7: memref<1x32xf32, #tpu.memory_space<vmem>>, %arg8: memref<64x32xbf16, #tpu.memory_space<vmem>>, %arg9: memref<1x32xf32, #tpu.memory_space<vmem>>, %arg10: memref<32x32xbf16, #tpu.memory_space<vmem>>, %arg11: memref<1x32xf32, #tpu.memory_space<vmem>>, %arg12: memref<32x32xbf16, #tpu.memory_space<vmem>>, %arg13: memref<1x32xf32, #tpu.memory_space<vmem>>, %arg14: memref<1x8x32xf32, #tpu.memory_space<vmem>>) attributes {dimension_semantics = [#tpu.dimension_semantics<parallel>], iteration_bounds = array<i64: 2>, scalar_prefetch = 0 : i64, scratch_operands = 0 : i64, tpu.core_type = #tpu.core_type<tc>, window_params = [{pipeline_mode = #tpu.pipeline_mode<synchronous>, transform_indices = @transform_0, window_bounds = array<i64: 8, 8>}, {transform_indices = @transform_1, window_bounds = array<i64: 1, 1, 8>}, {transform_indices = @transform_2, window_bounds = array<i64: 1, 8, 64>}, {transform_indices = @transform_3, window_bounds = array<i64: 1, 8, 64>}, {transform_indices = @transform_4, window_bounds = array<i64: 1, 8, 32>}, {pipeline_mode = #tpu.pipeline_mode<synchronous>, transform_indices = @transform_5, window_bounds = array<i64: 64, 32>}, {pipeline_mode = #tpu.pipeline_mode<synchronous>, transform_indices = @transform_6, window_bounds = array<i64: 1, 32>}, {pipeline_mode = #tpu.pipeline_mode<synchronous>, transform_indices = @transform_7, window_bounds = array<i64: 64, 32>}, {pipeline_mode = #tpu.pipeline_mode<synchronous>, transform_indices = @transform_8, window_bounds = array<i64: 1, 32>}, {pipeline_mode = #tpu.pipeline_mode<synchronous>, transform_indices = @transform_9, window_bounds = array<i64: 32, 32>}, {pipeline_mode = #tpu.pipeline_mode<synchronous>, transform_indices = @transform_10, window_bounds = array<i64: 1, 32>}, {pipeline_mode = #tpu.pipeline_mode<synchronous>, transform_indices = @transform_11, window_bounds = array<i64: 32, 32>}, {pipeline_mode = #tpu.pipeline_mode<synchronous>, transform_indices = @transform_12, window_bounds = array<i64: 1, 32>}, {transform_indices = @transform_13, window_bounds = array<i64: 1, 8, 32>}]} {
    %c0 = arith.constant 0 : index
    %c0_0 = arith.constant 0 : index
    %c0_1 = arith.constant 0 : index
    %0 = vector.load %arg3[%c0, %c0_0, %c0_1] : memref<1x8x64xbf16, #tpu.memory_space<vmem>>, vector<1x8x64xbf16>
    %1 = vector.shape_cast %0 : vector<1x8x64xbf16> to vector<8x64xbf16>
    %c0_2 = arith.constant 0 : index
    %c0_3 = arith.constant 0 : index
    %c0_4 = arith.constant 0 : index
    %2 = vector.load %arg4[%c0_2, %c0_3, %c0_4] : memref<1x8x64xbf16, #tpu.memory_space<vmem>>, vector<1x8x64xbf16>
    %3 = vector.shape_cast %2 : vector<1x8x64xbf16> to vector<8x64xbf16>
    %c0_5 = arith.constant 0 : index
    %c0_6 = arith.constant 0 : index
    %c0_7 = arith.constant 0 : index
    %4 = vector.load %arg5[%c0_5, %c0_6, %c0_7] : memref<1x8x32xbf16, #tpu.memory_space<vmem>>, vector<1x8x32xbf16>
    %5 = vector.shape_cast %4 : vector<1x8x32xbf16> to vector<8x32xbf16>
    %c0_8 = arith.constant 0 : index
    %c0_9 = arith.constant 0 : index
    %6 = vector.load %arg6[%c0_8, %c0_9] : memref<64x32xbf16, #tpu.memory_space<vmem>>, vector<64x32xbf16>
    %cst = arith.constant dense<0.000000e+00> : vector<8x32xf32>
    %7 = tpu.matmul %1, %6, %cst {dimension_numbers = #tpu.dot_dimension_numbers<[1], [0], [0], [1], [0, 0, 1, 1], [], []>} : vector<8x64xbf16>, vector<64x32xbf16>, vector<8x32xf32> -> vector<8x32xf32>
    %c0_10 = arith.constant 0 : index
    %c0_11 = arith.constant 0 : index
    %8 = vector.load %arg7[%c0_10, %c0_11] : memref<1x32xf32, #tpu.memory_space<vmem>>, vector<1x32xf32>
    %9 = vector.broadcast %8 : vector<1x32xf32> to vector<8x32xf32>
    %10 = arith.addf %7, %9 : vector<8x32xf32>
    %c0_12 = arith.constant 0 : index
    %c0_13 = arith.constant 0 : index
    %11 = vector.load %arg8[%c0_12, %c0_13] : memref<64x32xbf16, #tpu.memory_space<vmem>>, vector<64x32xbf16>
    %cst_14 = arith.constant dense<0.000000e+00> : vector<8x32xf32>
    %12 = tpu.matmul %3, %11, %cst_14 {dimension_numbers = #tpu.dot_dimension_numbers<[1], [0], [0], [1], [0, 0, 1, 1], [], []>} : vector<8x64xbf16>, vector<64x32xbf16>, vector<8x32xf32> -> vector<8x32xf32>
    %c0_15 = arith.constant 0 : index
    %c0_16 = arith.constant 0 : index
    %13 = vector.load %arg9[%c0_15, %c0_16] : memref<1x32xf32, #tpu.memory_space<vmem>>, vector<1x32xf32>
    %14 = vector.broadcast %13 : vector<1x32xf32> to vector<8x32xf32>
    %15 = arith.addf %12, %14 : vector<8x32xf32>
    %c0_17 = arith.constant 0 : index
    %c0_18 = arith.constant 0 : index
    %16 = vector.load %arg10[%c0_17, %c0_18] : memref<32x32xbf16, #tpu.memory_space<vmem>>, vector<32x32xbf16>
    %cst_19 = arith.constant dense<0.000000e+00> : vector<8x32xf32>
    %17 = tpu.matmul %5, %16, %cst_19 {dimension_numbers = #tpu.dot_dimension_numbers<[1], [0], [0], [1], [0, 0, 1, 1], [], []>} : vector<8x32xbf16>, vector<32x32xbf16>, vector<8x32xf32> -> vector<8x32xf32>
    %c0_20 = arith.constant 0 : index
    %c0_21 = arith.constant 0 : index
    %18 = vector.load %arg11[%c0_20, %c0_21] : memref<1x32xf32, #tpu.memory_space<vmem>>, vector<1x32xf32>
    %19 = vector.broadcast %18 : vector<1x32xf32> to vector<8x32xf32>
    %20 = arith.addf %17, %19 : vector<8x32xf32>
    %21 = vector.shape_cast %10 : vector<8x32xf32> to vector<1x8x32xf32>
    %22 = arith.truncf %21 : vector<1x8x32xf32> to vector<1x8x32xbf16>
    %23 = vector.shape_cast %15 : vector<8x32xf32> to vector<1x8x32xf32>
    %24 = arith.truncf %23 : vector<1x8x32xf32> to vector<1x8x32xbf16>
    %25 = vector.shape_cast %20 : vector<8x32xf32> to vector<1x8x32xf32>
    %26 = arith.truncf %25 : vector<1x8x32xf32> to vector<1x8x32xbf16>
    %c0_22 = arith.constant 0 : index
    %c0_23 = arith.constant 0 : index
    %27 = vector.load %arg12[%c0_22, %c0_23] : memref<32x32xbf16, #tpu.memory_space<vmem>>, vector<32x32xbf16>
    %c0_24 = arith.constant 0 : index
    %c0_25 = arith.constant 0 : index
    %28 = vector.load %arg13[%c0_24, %c0_25] : memref<1x32xf32, #tpu.memory_space<vmem>>, vector<1x32xf32>
    %c0_26 = arith.constant 0 : index
    %c0_27 = arith.constant 0 : index
    %29 = vector.load %arg1[%c0_26, %c0_27] : memref<8x8xf32, #tpu.memory_space<vmem>>, vector<8x8xf32>
    %c0_28 = arith.constant 0 : index
    %c0_29 = arith.constant 0 : index
    %c0_30 = arith.constant 0 : index
    %30 = vector.load %arg2[%c0_28, %c0_29, %c0_30] : memref<1x1x8xf32, #tpu.memory_space<vmem>>, vector<1x1x8xf32>
    %31 = vector.shape_cast %22 : vector<1x8x32xbf16> to vector<8x32xbf16>
    %32 = vector.shape_cast %24 : vector<1x8x32xbf16> to vector<8x32xbf16>
    %33 = vector.shape_cast %26 : vector<1x8x32xbf16> to vector<8x32xbf16>
    %34 = vector.shape_cast %30 : vector<1x1x8xf32> to vector<1x8xf32>
    %35 = vector.broadcast %34 : vector<1x8xf32> to vector<8x8xf32>
    %36 = arith.addf %29, %35 : vector<8x8xf32>
    %cst_31 = arith.constant 0.000000e+00 : f32
    %37 = vector.broadcast %cst_31 : f32 to vector<8x32xf32>
    %38 = vector.extract_strided_slice %31 {offsets = [0, 0], sizes = [8, 8], strides = [1, 1]} : vector<8x32xbf16> to vector<8x8xbf16>
    %39 = vector.extract_strided_slice %32 {offsets = [0, 0], sizes = [8, 8], strides = [1, 1]} : vector<8x32xbf16> to vector<8x8xbf16>
    %cst_32 = arith.constant dense<0.000000e+00> : vector<8x8xf32>
    %40 = tpu.matmul %38, %39, %cst_32 {dimension_numbers = #tpu.dot_dimension_numbers<[1], [1], [0], [0], [0, 0, 1, 0], [], []>} : vector<8x8xbf16>, vector<8x8xbf16>, vector<8x8xf32> -> vector<8x8xf32>
    %41 = arith.addf %40, %36 : vector<8x8xf32>
    %cst_33 = arith.constant dense<0xFF800000> : vector<8xf32>
    %42 = vector.multi_reduction <maximumf>, %41, %cst_33 [1] : vector<8x8xf32> to vector<8xf32>
    %43 = vector.shape_cast %42 : vector<8xf32> to vector<8x1xf32>
    %44 = vector.broadcast %43 : vector<8x1xf32> to vector<8x8xf32>
    %45 = arith.subf %41, %44 : vector<8x8xf32>
    %46 = math.exp %45 : vector<8x8xf32>
    %cst_34 = arith.constant dense<0.000000e+00> : vector<8xf32>
    %47 = vector.multi_reduction <add>, %46, %cst_34 [1] : vector<8x8xf32> to vector<8xf32>
    %48 = vector.shape_cast %47 : vector<8xf32> to vector<8x1xf32>
    %49 = tpu.reciprocal %48 {approx = true} : vector<8x1xf32> -> vector<8x1xf32>
    %50 = vector.broadcast %49 : vector<8x1xf32> to vector<8x8xf32>
    %51 = arith.mulf %46, %50 : vector<8x8xf32>
    %52 = arith.truncf %51 : vector<8x8xf32> to vector<8x8xbf16>
    %53 = vector.extract_strided_slice %33 {offsets = [0, 0], sizes = [8, 8], strides = [1, 1]} : vector<8x32xbf16> to vector<8x8xbf16>
    %cst_35 = arith.constant dense<0.000000e+00> : vector<8x8xf32>
    %54 = tpu.matmul %52, %53, %cst_35 {dimension_numbers = #tpu.dot_dimension_numbers<[1], [0], [0], [1], [0, 0, 1, 1], [], []>} : vector<8x8xbf16>, vector<8x8xbf16>, vector<8x8xf32> -> vector<8x8xf32>
    %55 = arith.truncf %54 : vector<8x8xf32> to vector<8x8xbf16>
    %56 = vector.extract_strided_slice %27 {offsets = [0, 0], sizes = [8, 32], strides = [1, 1]} : vector<32x32xbf16> to vector<8x32xbf16>
    %cst_36 = arith.constant dense<0.000000e+00> : vector<8x32xf32>
    %57 = tpu.matmul %55, %56, %cst_36 {dimension_numbers = #tpu.dot_dimension_numbers<[1], [0], [0], [1], [0, 0, 1, 1], [], []>} : vector<8x8xbf16>, vector<8x32xbf16>, vector<8x32xf32> -> vector<8x32xf32>
    %58 = arith.addf %37, %57 : vector<8x32xf32>
    %59 = vector.extract_strided_slice %31 {offsets = [0, 8], sizes = [8, 8], strides = [1, 1]} : vector<8x32xbf16> to vector<8x8xbf16>
    %60 = vector.extract_strided_slice %32 {offsets = [0, 8], sizes = [8, 8], strides = [1, 1]} : vector<8x32xbf16> to vector<8x8xbf16>
    %cst_37 = arith.constant dense<0.000000e+00> : vector<8x8xf32>
    %61 = tpu.matmul %59, %60, %cst_37 {dimension_numbers = #tpu.dot_dimension_numbers<[1], [1], [0], [0], [0, 0, 1, 0], [], []>} : vector<8x8xbf16>, vector<8x8xbf16>, vector<8x8xf32> -> vector<8x8xf32>
    %62 = arith.addf %61, %36 : vector<8x8xf32>
    %cst_38 = arith.constant dense<0xFF800000> : vector<8xf32>
    %63 = vector.multi_reduction <maximumf>, %62, %cst_38 [1] : vector<8x8xf32> to vector<8xf32>
    %64 = vector.shape_cast %63 : vector<8xf32> to vector<8x1xf32>
    %65 = vector.broadcast %64 : vector<8x1xf32> to vector<8x8xf32>
    %66 = arith.subf %62, %65 : vector<8x8xf32>
    %67 = math.exp %66 : vector<8x8xf32>
    %cst_39 = arith.constant dense<0.000000e+00> : vector<8xf32>
    %68 = vector.multi_reduction <add>, %67, %cst_39 [1] : vector<8x8xf32> to vector<8xf32>
    %69 = vector.shape_cast %68 : vector<8xf32> to vector<8x1xf32>
    %70 = tpu.reciprocal %69 {approx = true} : vector<8x1xf32> -> vector<8x1xf32>
    %71 = vector.broadcast %70 : vector<8x1xf32> to vector<8x8xf32>
    %72 = arith.mulf %67, %71 : vector<8x8xf32>
    %73 = arith.truncf %72 : vector<8x8xf32> to vector<8x8xbf16>
    %74 = vector.extract_strided_slice %33 {offsets = [0, 8], sizes = [8, 8], strides = [1, 1]} : vector<8x32xbf16> to vector<8x8xbf16>
    %cst_40 = arith.constant dense<0.000000e+00> : vector<8x8xf32>
    %75 = tpu.matmul %73, %74, %cst_40 {dimension_numbers = #tpu.dot_dimension_numbers<[1], [0], [0], [1], [0, 0, 1, 1], [], []>} : vector<8x8xbf16>, vector<8x8xbf16>, vector<8x8xf32> -> vector<8x8xf32>
    %76 = arith.truncf %75 : vector<8x8xf32> to vector<8x8xbf16>
    %77 = vector.extract_strided_slice %27 {offsets = [8, 0], sizes = [8, 32], strides = [1, 1]} : vector<32x32xbf16> to vector<8x32xbf16>
    %cst_41 = arith.constant dense<0.000000e+00> : vector<8x32xf32>
    %78 = tpu.matmul %76, %77, %cst_41 {dimension_numbers = #tpu.dot_dimension_numbers<[1], [0], [0], [1], [0, 0, 1, 1], [], []>} : vector<8x8xbf16>, vector<8x32xbf16>, vector<8x32xf32> -> vector<8x32xf32>
    %79 = arith.addf %58, %78 : vector<8x32xf32>
    %80 = vector.extract_strided_slice %31 {offsets = [0, 16], sizes = [8, 8], strides = [1, 1]} : vector<8x32xbf16> to vector<8x8xbf16>
    %81 = vector.extract_strided_slice %32 {offsets = [0, 16], sizes = [8, 8], strides = [1, 1]} : vector<8x32xbf16> to vector<8x8xbf16>
    %cst_42 = arith.constant dense<0.000000e+00> : vector<8x8xf32>
    %82 = tpu.matmul %80, %81, %cst_42 {dimension_numbers = #tpu.dot_dimension_numbers<[1], [1], [0], [0], [0, 0, 1, 0], [], []>} : vector<8x8xbf16>, vector<8x8xbf16>, vector<8x8xf32> -> vector<8x8xf32>
    %83 = arith.addf %82, %36 : vector<8x8xf32>
    %cst_43 = arith.constant dense<0xFF800000> : vector<8xf32>
    %84 = vector.multi_reduction <maximumf>, %83, %cst_43 [1] : vector<8x8xf32> to vector<8xf32>
    %85 = vector.shape_cast %84 : vector<8xf32> to vector<8x1xf32>
    %86 = vector.broadcast %85 : vector<8x1xf32> to vector<8x8xf32>
    %87 = arith.subf %83, %86 : vector<8x8xf32>
    %88 = math.exp %87 : vector<8x8xf32>
    %cst_44 = arith.constant dense<0.000000e+00> : vector<8xf32>
    %89 = vector.multi_reduction <add>, %88, %cst_44 [1] : vector<8x8xf32> to vector<8xf32>
    %90 = vector.shape_cast %89 : vector<8xf32> to vector<8x1xf32>
    %91 = tpu.reciprocal %90 {approx = true} : vector<8x1xf32> -> vector<8x1xf32>
    %92 = vector.broadcast %91 : vector<8x1xf32> to vector<8x8xf32>
    %93 = arith.mulf %88, %92 : vector<8x8xf32>
    %94 = arith.truncf %93 : vector<8x8xf32> to vector<8x8xbf16>
    %95 = vector.extract_strided_slice %33 {offsets = [0, 16], sizes = [8, 8], strides = [1, 1]} : vector<8x32xbf16> to vector<8x8xbf16>
    %cst_45 = arith.constant dense<0.000000e+00> : vector<8x8xf32>
    %96 = tpu.matmul %94, %95, %cst_45 {dimension_numbers = #tpu.dot_dimension_numbers<[1], [0], [0], [1], [0, 0, 1, 1], [], []>} : vector<8x8xbf16>, vector<8x8xbf16>, vector<8x8xf32> -> vector<8x8xf32>
    %97 = arith.truncf %96 : vector<8x8xf32> to vector<8x8xbf16>
    %98 = vector.extract_strided_slice %27 {offsets = [16, 0], sizes = [8, 32], strides = [1, 1]} : vector<32x32xbf16> to vector<8x32xbf16>
    %cst_46 = arith.constant dense<0.000000e+00> : vector<8x32xf32>
    %99 = tpu.matmul %97, %98, %cst_46 {dimension_numbers = #tpu.dot_dimension_numbers<[1], [0], [0], [1], [0, 0, 1, 1], [], []>} : vector<8x8xbf16>, vector<8x32xbf16>, vector<8x32xf32> -> vector<8x32xf32>
    %100 = arith.addf %79, %99 : vector<8x32xf32>
    %101 = vector.extract_strided_slice %31 {offsets = [0, 24], sizes = [8, 8], strides = [1, 1]} : vector<8x32xbf16> to vector<8x8xbf16>
    %102 = vector.extract_strided_slice %32 {offsets = [0, 24], sizes = [8, 8], strides = [1, 1]} : vector<8x32xbf16> to vector<8x8xbf16>
    %cst_47 = arith.constant dense<0.000000e+00> : vector<8x8xf32>
    %103 = tpu.matmul %101, %102, %cst_47 {dimension_numbers = #tpu.dot_dimension_numbers<[1], [1], [0], [0], [0, 0, 1, 0], [], []>} : vector<8x8xbf16>, vector<8x8xbf16>, vector<8x8xf32> -> vector<8x8xf32>
    %104 = arith.addf %103, %36 : vector<8x8xf32>
    %cst_48 = arith.constant dense<0xFF800000> : vector<8xf32>
    %105 = vector.multi_reduction <maximumf>, %104, %cst_48 [1] : vector<8x8xf32> to vector<8xf32>
    %106 = vector.shape_cast %105 : vector<8xf32> to vector<8x1xf32>
    %107 = vector.broadcast %106 : vector<8x1xf32> to vector<8x8xf32>
    %108 = arith.subf %104, %107 : vector<8x8xf32>
    %109 = math.exp %108 : vector<8x8xf32>
    %cst_49 = arith.constant dense<0.000000e+00> : vector<8xf32>
    %110 = vector.multi_reduction <add>, %109, %cst_49 [1] : vector<8x8xf32> to vector<8xf32>
    %111 = vector.shape_cast %110 : vector<8xf32> to vector<8x1xf32>
    %112 = tpu.reciprocal %111 {approx = true} : vector<8x1xf32> -> vector<8x1xf32>
    %113 = vector.broadcast %112 : vector<8x1xf32> to vector<8x8xf32>
    %114 = arith.mulf %109, %113 : vector<8x8xf32>
    %115 = arith.truncf %114 : vector<8x8xf32> to vector<8x8xbf16>
    %116 = vector.extract_strided_slice %33 {offsets = [0, 24], sizes = [8, 8], strides = [1, 1]} : vector<8x32xbf16> to vector<8x8xbf16>
    %cst_50 = arith.constant dense<0.000000e+00> : vector<8x8xf32>
    %117 = tpu.matmul %115, %116, %cst_50 {dimension_numbers = #tpu.dot_dimension_numbers<[1], [0], [0], [1], [0, 0, 1, 1], [], []>} : vector<8x8xbf16>, vector<8x8xbf16>, vector<8x8xf32> -> vector<8x8xf32>
    %118 = arith.truncf %117 : vector<8x8xf32> to vector<8x8xbf16>
    %119 = vector.extract_strided_slice %27 {offsets = [24, 0], sizes = [8, 32], strides = [1, 1]} : vector<32x32xbf16> to vector<8x32xbf16>
    %cst_51 = arith.constant dense<0.000000e+00> : vector<8x32xf32>
    %120 = tpu.matmul %118, %119, %cst_51 {dimension_numbers = #tpu.dot_dimension_numbers<[1], [0], [0], [1], [0, 0, 1, 1], [], []>} : vector<8x8xbf16>, vector<8x32xbf16>, vector<8x32xf32> -> vector<8x32xf32>
    %121 = arith.addf %100, %120 : vector<8x32xf32>
    %122 = vector.broadcast %28 : vector<1x32xf32> to vector<8x32xf32>
    %123 = arith.addf %121, %122 : vector<8x32xf32>
    %c0_52 = arith.constant 0 : index
    %c0_53 = arith.constant 0 : index
    %c0_54 = arith.constant 0 : index
    %124 = vector.load %arg14[%c0_52, %c0_53, %c0_54] : memref<1x8x32xf32, #tpu.memory_space<vmem>>, vector<1x8x32xf32>
    %125 = vector.shape_cast %124 : vector<1x8x32xf32> to vector<8x32xf32>
    %126 = vector.shape_cast %123 : vector<8x32xf32> to vector<1x8x32xf32>
    tpu.vector_store %arg14[%c0_52, %c0_53, %c0_54], %126 {strides = array<i32>} : memref<1x8x32xf32, #tpu.memory_space<vmem>>, vector<1x8x32xf32>,
    return
  }
  func.func @transform_0(%arg0: i32) -> (i32, i32) {
    %c0_i32 = arith.constant 0 : i32
    %c0_i32_0 = arith.constant 0 : i32
    %c0_i32_1 = arith.constant 0 : i32
    return %c0_i32, %c0_i32_0 : i32, i32
  }
  func.func @transform_1(%arg0: i32) -> (i32, i32, i32) {
    %c0_i32 = arith.constant 0 : i32
    %c0_i32_0 = arith.constant 0 : i32
    %c0_i32_1 = arith.constant 0 : i32
    return %arg0, %c0_i32, %c0_i32_0 : i32, i32, i32
  }
  func.func @transform_2(%arg0: i32) -> (i32, i32, i32) {
    %c0_i32 = arith.constant 0 : i32
    %c0_i32_0 = arith.constant 0 : i32
    %c0_i32_1 = arith.constant 0 : i32
    return %arg0, %c0_i32, %c0_i32_0 : i32, i32, i32
  }
  func.func @transform_3(%arg0: i32) -> (i32, i32, i32) {
    %c0_i32 = arith.constant 0 : i32
    %c0_i32_0 = arith.constant 0 : i32
    %c0_i32_1 = arith.constant 0 : i32
    return %arg0, %c0_i32, %c0_i32_0 : i32, i32, i32
  }
  func.func @transform_4(%arg0: i32) -> (i32, i32, i32) {
    %c0_i32 = arith.constant 0 : i32
    %c0_i32_0 = arith.constant 0 : i32
    %c0_i32_1 = arith.constant 0 : i32
    return %arg0, %c0_i32, %c0_i32_0 : i32, i32, i32
  }
  func.func @transform_5(%arg0: i32) -> (i32, i32) {
    %c0_i32 = arith.constant 0 : i32
    %c0_i32_0 = arith.constant 0 : i32
    %c0_i32_1 = arith.constant 0 : i32
    return %c0_i32, %c0_i32_0 : i32, i32
  }
  func.func @transform_6(%arg0: i32) -> (i32, i32) {
    %c0_i32 = arith.constant 0 : i32
    %c0_i32_0 = arith.constant 0 : i32
    %c0_i32_1 = arith.constant 0 : i32
    return %c0_i32, %c0_i32_0 : i32, i32
  }
  func.func @transform_7(%arg0: i32) -> (i32, i32) {
    %c0_i32 = arith.constant 0 : i32
    %c0_i32_0 = arith.constant 0 : i32
    %c0_i32_1 = arith.constant 0 : i32
    return %c0_i32, %c0_i32_0 : i32, i32
  }
  func.func @transform_8(%arg0: i32) -> (i32, i32) {
    %c0_i32 = arith.constant 0 : i32
    %c0_i32_0 = arith.constant 0 : i32
    %c0_i32_1 = arith.constant 0 : i32
    return %c0_i32, %c0_i32_0 : i32, i32
  }
  func.func @transform_9(%arg0: i32) -> (i32, i32) {
    %c0_i32 = arith.constant 0 : i32
    %c0_i32_0 = arith.constant 0 : i32
    %c0_i32_1 = arith.constant 0 : i32
    return %c0_i32, %c0_i32_0 : i32, i32
  }
  func.func @transform_10(%arg0: i32) -> (i32, i32) {
    %c0_i32 = arith.constant 0 : i32
    %c0_i32_0 = arith.constant 0 : i32
    %c0_i32_1 = arith.constant 0 : i32
    return %c0_i32, %c0_i32_0 : i32, i32
  }
  func.func @transform_11(%arg0: i32) -> (i32, i32) {
    %c0_i32 = arith.constant 0 : i32
    %c0_i32_0 = arith.constant 0 : i32
    %c0_i32_1 = arith.constant 0 : i32
    return %c0_i32, %c0_i32_0 : i32, i32
  }
  func.func @transform_12(%arg0: i32) -> (i32, i32) {
    %c0_i32 = arith.constant 0 : i32
    %c0_i32_0 = arith.constant 0 : i32
    %c0_i32_1 = arith.constant 0 : i32
    return %c0_i32, %c0_i32_0 : i32, i32
  }
  func.func @transform_13(%arg0: i32) -> (i32, i32, i32) {
    %c0_i32 = arith.constant 0 : i32
    %c0_i32_0 = arith.constant 0 : i32
    %c0_i32_1 = arith.constant 0 : i32
    return %arg0, %c0_i32, %c0_i32_0 : i32, i32, i32
  }
}

</mosaic_0001>

<bundles_post_ra>
// kernel: tpu_custom_call.1
= control target key start
LH: loop header
LB: loop body
LE: loop exit
PB: predicated region body
PF: predicated region fallthrough
CT: control target
= control target key end

     0   :  { %18 = vsyncpa [#allocation3], 0  ;;  %s2164_s0 = inlined_call_operand.vmem [shape: f32[8,8], index: 0, kind: input, shape index: {}]   ;;  %s2165_s1 = inlined_call_operand.vmem [shape: f32[2,1,8], index: 1, kind: input, shape index: {}]   ;;  %s2166_s2 = inlined_call_operand.vmem [shape: bf16[2,8,64], index: 2, kind: input, shape index: {}]   ;;  %s2167_s3 = inlined_call_operand.vmem [shape: bf16[2,8,64], index: 3, kind: input, shape index: {}]   ;;  %s2168_s4 = inlined_call_operand.vmem [shape: bf16[2,8,32], index: 4, kind: input, shape index: {}]   ;;  %s2169_s5 = inlined_call_operand.vmem [shape: bf16[64,32], index: 5, kind: input, shape index: {}]   ;;  %s2170_s6 = inlined_call_operand.vmem [shape: f32[1,32], index: 6, kind: input, shape index: {}]   ;;  %s2171_s7 = inlined_call_operand.vmem [shape: bf16[64,32], index: 7, kind: input, shape index: {}]   ;;  %s2172_s8 = inlined_call_operand.vmem [shape: f32[1,32], index: 8, kind: input, shape index: {}]   ;;  %s2173_s9 = inlined_call_operand.vmem [shape: bf16[32,32], index: 9, kind: input, shape index: {}]   ;;  %s2174_s10 = inlined_call_operand.vmem [shape: f32[1,32], index: 10, kind: input, shape index: {}]   ;;  %s2175_s11 = inlined_call_operand.vmem [shape: bf16[32,32], index: 11, kind: input, shape index: {}]   ;;  %s2176_s12 = inlined_call_operand.vmem [shape: f32[1,32], index: 12, kind: input, shape index: {}]   ;;  %s2177_s13 = inlined_call_operand.hbm [shape: f32[2,8,32], index: 13, kind: output, shape index: {}]  }
   0x1   :  { %20 = vsyncpa [#allocation3 + $0x1], 0  ;;  %s1871_s25 = smov 0   ;;  %s1873_s26 = smov 0  }
   0x2   :  { %s1875_s27 = smov 0   ;;  %s1877_s28 = smov 0  }
   0x3 LB: > { %2182 = sst [smem:[#allocation5_spill]] %s1789_s27  ;;  %s1892_s29 = sadd.s32 4294967295, %s1793_s28   ;;  %s1793_s28 = sphi %s1877_s28, %s2189_s28   ;;  %s1789_s27 = sphi %s1875_s27, %s2191_s27   ;;  %s1785_s26 = sphi %s1873_s26, %s2193_s26   ;;  %s1781_s25 = sphi %s1871_s25, %s2192_s25  }
   0x4   : > { %s1480_s30 = sadd.s32 4294967294, %s1793_s28   ;;  %s1896_s14 = sadd.s32 1, %s1793_s28  }
   0x5   : > { %2183 = sst [smem:[#allocation6_spill]] %s1896_s14  ;;  %s326_s15 = sadd.s32 1, %s1789_s27 }
   0x6   : > { %s323_s16 = ssub.s32 %s1793_s28, %s1896_s14  ;;  %p336_p0 = scmp.ne.s32.totalorder %s1789_s27, %s1785_s26 }
   0x7   : > { %p324_p1 = scmp.eq.s32.totalorder %s323_s16, 0  ;;  %p337_p2 = scmp.eq.s32.totalorder %s1892_s29, 1 }
   0x8   : > { %p342_p3 = scmp.ne.s32.totalorder %s1785_s26, %s1781_s25  ;;  %p343_p4 = scmp.eq.s32.totalorder %s1480_s30, 1 }
   0x9   : > { %s1907_s17 = scalar_select %p324_p1, %s1789_s27, %s326_s15  }
   0xa   : > { %p1909_p5 = por %p337_p2, %p336_p0  ;;  %p1913_p6 = por %p343_p4, %p342_p3 }
   0xb   : > { %2184 = sst [smem:[#allocation7_spill]] %s1907_s17  ;;  %p1483_p7 = scmp.ge.s32.totalorder %s1793_s28, 1 }
   0xc   : > { %s2186_s19 = scalar_select %p1913_p6, 1, 0 }
   0xd   : > { %p415_p8 = scmp.lt.s32.totalorder %s1793_s28, 3 }
   0xe   : > { %2187 = sst [smem:[#allocation8_spill]] %s2186_s19 }
   0xf   : > { %p416_p9 = pnand %p1483_p7, %p415_p8 }
  0x10   : > { %p469_p10 = scmp.lt.s32.totalorder (!%p416_p9), %s1892_s29, 1  ;;  %s1798_s23 = smov (!%p416_p9), 112  }
  0x11   : > { %419 = sbr.rel (%p416_p9) target bundleno = 2503 (0x9c7), region = 72  ;;  %s1519_s15 = sshll.u32 (!%p416_p9), %s1892_s29, 7 }
  0x12   : > { %s1800_s21 = smov (!%p416_p9), [#allocation2]  }
  0x16   : > { %v1707_v0 = vld [vmem:[%s2171_s7 + $0x18] sm:$0xff]   ;;  %v1795_v1 = vmov 0.0   ;;  %v1709_v3 = vld [vmem:[%s2171_s7 + $0x10] sm:$0xff]   ;;  %vm1796_vm0 = vmmov 0   ;;  %s1939_s20 = scalar_select %p469_p10, %s1892_s29, 1  ;;  %v1711_v5 = vld [vmem:[%s2171_s7 + $0x8] sm:$0xff]  }
  0x17   : > { %1571 = vmatprep.subr.bf16.mxu1 %v1795_v1  ;;  %1559 = vmatprep.subr.bf16.mxu0 %v1795_v1  ;;  %v1708_v2 = vld [vmem:[%s2169_s5 + $0x18] sm:$0xff]   ;;  %v1710_v4 = vld [vmem:[%s2169_s5 + $0x10] sm:$0xff]   ;;  %v1712_v6 = vld [vmem:[%s2169_s5 + $0x8] sm:$0xff]   ;;  %vm527_vm1 = vcmask 523264   ;;  %vm737_vm2 = vcmask 64512   ;;  %vm676_vm3 = vcmask 261120  }
  0x18   : > { %1572 = vmatpush3.bf16.msra.mxu1 %v1707_v0  ;;  %1579 = vmatprep.mubr.msk.bf16.mxu1 %vm1796_vm0, %v1795_v1  ;;  %s1952_s30 = sshll.u32 %s1939_s20, 2  ;;  %v1713_v7 = vld [vmem:[%s2171_s7] sm:$0xff]   ;;  %v1715_v26 = vld [vmem:[%s2173_s9 + $0x8] sm:$0xff]   ;;  %vm799_vm4 = vcmask 1043456  }
  0x19   : > { %1560 = vmatpush3.bf16.msra.mxu0 %v1708_v2  ;;  %1573 = vmatprep.subr.bf16.mxu1 %v1795_v1  ;;  %v1714_v8 = vld [vmem:[%s2169_s5] sm:$0xff]   ;;  %s479_s17 = scalar_lea.vmem %s2167_s3, %s1952_s30  ;;  %s475_s19 = scalar_lea.vmem %s2166_s2, %s1952_s30 }
  0x1a   : > { %1561 = vmatprep.subr.bf16.mxu0 %v1795_v1  ;;  %1567 = vmatprep.mubr.msk.bf16.mxu0 %vm1796_vm0, %v1795_v1  ;;  %v486_v9 = vld [vmem:[%s479_s17] sm:$0xf]  ;;  %s483_s27 = scalar_lea.vmem %s2168_s4, %s1952_s30  ;;  %s471_s17 = scalar_lea.vmem %s2165_s1, %s1939_s20 }
  0x1b   : > { %v485_v10 = vld [vmem:[%s475_s19] sm:$0xf]  ;;  %s1797_s19 = smov 120   ;;  %s1799_s30 = smov 104  }
  0x1c   : > { %1574 = vmatpush3.bf16.msra.mxu1 %v1709_v3  ;;  %v1494_v11 = vld [vmem:[%s2172_s8] ss:$0 sm:$0xff]  ;;  %s466_s20 = sand.u32 1, %s1785_s26  }
  0x1d   : > { %1562 = vmatpush3.bf16.msra.mxu0 %v1710_v4  ;;  %1575 = vmatprep.subr.bf16.mxu1 %v1795_v1  ;;  %v1488_v12 = vld [vmem:[%s2170_s6] ss:$0 sm:$0xff]  ;;  %s1484_s22 = sshll.u32 %s466_s20, 3  ;;  %s1375_s29 = scalar_lea.sflag [#allocation3], %s466_s20 }
  0x1e   : > { %1563 = vmatprep.subr.bf16.mxu0 %v1795_v1  ;;  %v1716_v27 = vld [vmem:[%s2173_s9] sm:$0xff]  }
  0x1f   : > { %v487_v28 = vld [vmem:[%s483_s27] sm:$0xf] }
  0x20   : > { %1576 = vmatpush3.bf16.msra.mxu1 %v1711_v5  ;;  %v728_v32 = vld [vmem:[%s2164_s0] sm:$0xff] }
  0x21   : > { %1564 = vmatpush3.bf16.msra.mxu0 %v1712_v6  ;;  %1577 = vmatprep.subr.bf16.mxu1 %v1795_v1  ;;  %v1504_v33 = vld [vmem:[%s471_s17] ss:$0 sm:$0xff]  ;;  %v724_v6 = vld [vmem:[%s2175_s11 + $0x4] sm:$0xf]  ;;  %s2122_s17 = scalar_lea.hbm %s2177_s13, %s1519_s15 }
  0x22   : > { %1565 = vmatprep.subr.bf16.mxu0 %v1795_v1  ;;  %v2024_v34 = vadd.f32 %v1504_v33, %v728_v32  ;;  %v1500_v56 = vld [vmem:[%s2174_s10] ss:$0 sm:$0xff] }
  0x24   : > { %1578 = vmatpush3.bf16.msra.mxu1 %v1713_v7  ;;  %v962_v7 = vsel %vm799_vm4, %v724_v6, 0 }
  0x25   : > { %1566 = vmatpush3.bf16.msra.mxu0 %v1714_v8  ;;  %1591 = vmatprep.subr.bf16.mxu1 %v1795_v1 }
  0x26   : > { %1583 = vmatprep.subr.bf16.mxu0 %v1795_v1 }
  0x27   : > { %1580 = vmatmul.mubr.msk.bf16.vlgmr.msra.gmra.mxu1 %vm527_vm1, %v486_v9 }
  0x28   : > { %1568 = vmatmul.mubr.msk.bf16.vlgmr.msra.gmra.mxu0 %vm527_vm1, %v485_v10  ;;  %1593 = vmatprep.mubr.msk.bf16.mxu1 %vm1796_vm0, %v1795_v1 }
  0x29   : > { %1587 = vmatprep.mubr.msk.bf16.mxu0 %vm1796_vm0, %v1795_v1  ;;  %1584 = vmatpush3.bf16.msra.mxu0 %v1715_v26 }
  0x2a   : > { %1585 = vmatprep.subr.bf16.mxu0 %v1795_v1 }
  0x2d   : > { %1586 = vmatpush3.bf16.msra.mxu0 %v1716_v27 }
  0x2e   : > { %1597 = vmatprep.subr.bf16.mxu0 %v1795_v1 }
  0x30   : > { %1588 = vmatmul.mubr.msk.bf16.vlgmr.msra.gmra.mxu0 %vm676_vm3, %v487_v28 }
  0x31   : > { %1599 = vmatprep.mubr.msk.bf16.mxu0 %vm1796_vm0, %v1795_v1 }
  0xe7   : > { %v647_v13 = vpop.f32.mrf.mxu1 }
  0xe8   : > { %v648_v14 = vadd.f32 %v1494_v11, %v647_v13  ;;  %v565_v15 = vpop.f32.mrf.mxu0 }
  0xe9   : > { %v1581_v16 = vpop.f32.mrf.mxu1  ;;  %v566_v17 = vadd.f32 %v1488_v12, %v565_v15  ;;  %v723_v12 = vld [vmem:[%s2175_s11] sm:$0xf] }
  0xea   : > { %v1982_v18 = vpack.c.bf16 %v648_v14, %v648_v14  ;;  %v1569_v19 = vpop.f32.mrf.mxu0  ;;  %v1008_v15 = vsel %vm799_vm4, %v723_v12, 0 }
  0xeb   : > { %v650_v20 = vpop.f32.mrf.mxu1  ;;  %v1984_v21 = vpack.c.bf16 %v566_v17, %v566_v17 }
  0xec   : > { %848 = vrot.lane.b32.xlu0 %v1982_v18, %s1797_s19  ;;  %v742_v22 = vsel %vm737_vm2, %v1982_v18, 0  ;;  %v568_v23 = vpop.f32.mrf.mxu0 }
  0xed   : > { %v1582_v24 = vpop.f32.mrf.mxu1  ;;  %1592 = vmatpush3.bf16.xpose.msra.mxu1 %v742_v22 }
  0xee   : > { %v1570_v25 = vpop.f32.mrf.mxu0  ;;  %1603 = vmatprep.subr.bf16.mxu1 %v1795_v1 }
  0xf0   : > { %845 = vrot.lane.b32.xlu0 %v1984_v21, %s1797_s19  ;;  %v714_v50 = vpop.f32.mrf.mxu0 }
  0xf1   : > { %v715_v57 = vadd.f32 %v1500_v56, %v714_v50 }
  0xf2   : > { %v1589_v51 = vpop.f32.mrf.mxu0 }
  0xf3   : > { %v2034_v58 = vpack.c.bf16 %v715_v57, %v715_v57 }
  0xf4   : > { %1594 = vmatmul.mubr.msk.bf16.vlgmr.msra.gmra.mxu1 %vm737_vm2, %v1984_v21  ;;  %v717_v52 = vpop.f32.mrf.mxu0 }
  0xf5   : > { %1605 = vmatprep.mubr.msk.bf16.mxu1 %vm1796_vm0, %v1795_v1  ;;  %v801_v59 = vsel %vm799_vm4, %v2034_v58, 0 }
  0xf6   : > { %v1590_v53 = vpop.f32.mrf.mxu0  ;;  %1598 = vmatpush3.bf16.msra.mxu0 %v801_v59 }
  0xf7   : > { %1609 = vmatprep.subr.bf16.mxu0 %v1795_v1 }
 0x15e   : > { %v849_v29 = vpop.permute.xlu0 %848 }
 0x15f   : > { %v854_v30 = vsel %vm737_vm2, %v849_v29, 0 }
 0x160   : > { %1604 = vmatpush3.bf16.xpose.msra.mxu1 %v854_v30 }
 0x161   : > { %1615 = vmatprep.subr.bf16.mxu1 %v1795_v1 }
 0x162   : > { %v846_v31 = vpop.permute.xlu0 %845 }
 0x167   : > { %1606 = vmatmul.mubr.msk.bf16.vlgmr.msra.gmra.mxu1 %vm737_vm2, %v846_v31 }
 0x168   : > { %1617 = vmatprep.mubr.msk.bf16.mxu1 %vm1796_vm0, %v1795_v1  ;;  %1616 = vmatpush3.bf16.msra.mxu1 %v962_v7 }
 0x169   : > { %1627 = vmatprep.subr.bf16.mxu1 %v1795_v1 }
 0x1b4   : > { %v778_v35 = vpop.f32.mrf.mxu1 }
 0x1b5   : > { %v779_v36 = vadd.f32 %v778_v35, %v2024_v34 }
 0x1b6   : > { %v1595_v37 = vpop.f32.mrf.mxu1 }
 0x1b7   : > { %v784_v38 = vsel %vm737_vm2, %v779_v36, -inf }
 0x1b8   : > { %v781_v39 = vpop.f32.mrf.mxu1  ;;  %785 = vmax.xlane.f32.xlu1 %v784_v38 }
 0x1ba   : > { %v1596_v40 = vpop.f32.mrf.mxu1 }
 0x227   : > { %v890_v41 = vpop.f32.mrf.mxu1 }
 0x228   : > { %v891_v42 = vadd.f32 %v890_v41, %v2024_v34 }
 0x229   : > { %v1607_v43 = vpop.f32.mrf.mxu1 }
 0x22a   : > { %v896_v44 = vsel %vm737_vm2, %v891_v42, -inf }
 0x22b   : > { %v893_v45 = vpop.f32.mrf.mxu1  ;;  %897 = vmax.xlane.f32.xlu1 %v896_v44 }
 0x22d   : > { %v1608_v46 = vpop.f32.mrf.mxu1 }
 0x241   : > { %v786_v47 = vpop.xlane.xlu1 %785 }
 0x242   : > { %v787_v48 = vsub.f32 %v779_v36, %v786_v47 }
 0x244   : > { %v788_v49 = vmul.f32 1.442695, %v787_v48 }
 0x246   : > { %1717 = vpow2.f32 %v788_v49 }
 0x253   : > { %v1718_v54 = vpop.eup %1717 }
 0x254   : > { %v790_v55 = vsel %vm737_vm2, %v1718_v54, 0.0 }
 0x255   : > { %791 = vadd.xlane.f32.xlu0 %v790_v55 }
 0x26b   : > { %1112 = vrot.lane.b32.xlu0 %v2034_v58, %s1798_s23 }
 0x2b4   : > { %v898_v60 = vpop.xlane.xlu1 %897 }
 0x2b5   : > { %v899_v61 = vsub.f32 %v891_v42, %v898_v60 }
 0x2b7   : > { %v900_v62 = vmul.f32 1.442695, %v899_v61 }
 0x2b9   : > { %1719 = vpow2.f32 %v900_v62 }
 0x2c6   : > { %v1720_v63 = vpop.eup %1719 }
 0x2c7   : > { %v902_v0 = vsel %vm737_vm2, %v1720_v63, 0.0 }
 0x2c8   : > { %903 = vadd.xlane.f32.xlu1 %v902_v0 }
 0x2d9   : > { %909 = vrot.lane.b32.xlu1 %v2034_v58, %s1797_s19  ;;  %s468_s19 = scalar_lea.vmem [#allocation2], %s1484_s22  ;;  %s1737_s22 = sshll.u32 %s1800_s21, 4  ;;  %s1738_s22 = int_to_ptr.vmem [resolvable:$false] %s1737_s22 }
 0x2da   : > { %s1388_s27 = sshll.u32 %s468_s19, 4  ;;  %s2124_s27 = int_to_ptr.vmem [resolvable:$true] %s1388_s27 }
 0x2db   : > { %s1733_s16 = scalar_lea.vmem %s2124_s27, 128  ;;  %p1740_p0 = scmp.lt.s32.totalorder %s2124_s27, %s1738_s22 }
 0x2dc   : > { %p1734_p11 = scmp.ne.s32.totalorder %s2124_s27, %s1733_s16 }
 0x2dd   : > { %1052 = vrot.lane.b32.xlu1 %v1982_v18, %s1798_s23 }
 0x2de   : > { %v792_v2 = vpop.xlane.xlu0 %791  ;;  %p1735_p12 = pnand %p1734_p11, %p1909_p5 }
 0x2df   : > { %1721 = vrcp.f32 %v792_v2 }
 0x2e0   : > { %p1736_p13 = pneg %p1735_p12 }
 0x2e1   : > { %1050 = vrot.lane.b32.xlu1 %v1984_v21, %s1798_s23  ;;  %s1739_s23 = scalar_lea.vmem %s1738_s22, 256 }
 0x2e2   : > { %v1113_v16 = vpop.permute.xlu0 %1112  ;;  %p1741_p1 = scmp.lt.s32.totalorder %s1739_s23, %s1733_s16 }
 0x2e3   : > { %v1118_v22 = vsel %vm799_vm4, %v1113_v16, 0  ;;  %v726_v16 = vld [vmem:[%s2175_s11 + $0xc] sm:$0xf] }
 0x2e4   : > { %p1742_p2 = por %p1741_p1, %p1740_p0 }
 0x2e6   : > { %p1743_p3 = pnand %p1742_p2, %p1736_p13 }
 0x2ec   : > { %v1722_v3 = vpop.eup %1721 }
 0x2ed   : > { %v794_v4 = vmul.f32 %v1722_v3, %v1718_v54 }
 0x2ef   : > { %v795_v5 = vpack.c.bf16 %v794_v4, %v794_v4 }
 0x2f1   : > { %1600 = vmatmul.mubr.msk.bf16.vlgmr.msra.gmra.mxu0 %vm737_vm2, %v795_v5 }
 0x2f2   : > { %1611 = vmatprep.mubr.msk.bf16.mxu0 %vm1796_vm0, %v1795_v1 }
 0x351   : > { %v904_v8 = vpop.xlane.xlu1 %903 }
 0x352   : > { %1723 = vrcp.f32 %v904_v8 }
 0x355   : > { %v910_v9 = vpop.permute.xlu1 %909 }
 0x356   : > { %v915_v10 = vsel %vm799_vm4, %v910_v9, 0 }
 0x357   : > { %1610 = vmatpush3.bf16.msra.mxu0 %v915_v10 }
 0x358   : > { %1621 = vmatprep.subr.bf16.mxu0 %v1795_v1 }
 0x359   : > { %v1053_v25 = vpop.permute.xlu1 %1052 }
 0x35a   : > { %v1058_v29 = vsel %vm737_vm2, %v1053_v25, 0 }
 0x35d   : > { %v1051_v32 = vpop.permute.xlu1 %1050 }
 0x35f   : > { %v1724_v11 = vpop.eup %1723 }
 0x360   : > { %v906_v13 = vmul.f32 %v1724_v11, %v1720_v63 }
 0x362   : > { %v907_v14 = vpack.c.bf16 %v906_v13, %v906_v13 }
 0x364   : > { %1612 = vmatmul.mubr.msk.bf16.vlgmr.msra.gmra.mxu0 %vm737_vm2, %v907_v14 }
 0x365   : > { %1622 = vmatpush3.bf16.msra.mxu0 %v1008_v15  ;;  %1623 = vmatprep.mubr.msk.bf16.mxu0 %vm1796_vm0, %v1795_v1 }
 0x366   : > { %1633 = vmatprep.subr.bf16.mxu0 %v1795_v1 }
 0x3b1   : > { %v837_v17 = vpop.f32.mrf.mxu0 }
 0x3b2   : > { %v843_v19 = vpack.c.bf16 %v837_v17, %v837_v17  ;;  %v1323_v17 = vsel %vm799_vm4, %v726_v16, 0 }
 0x3b3   : > { %v1601_v20 = vpop.f32.mrf.mxu0 }
 0x3b4   : > { %1624 = vmatmul.mubr.msk.bf16.vlgmr.msra.gmra.mxu0 %vm737_vm2, %v843_v19 }
 0x3b5   : > { %1634 = vmatpush3.bf16.msra.mxu0 %v1118_v22  ;;  %v840_v23 = vpop.f32.mrf.mxu0  ;;  %1635 = vmatprep.mubr.msk.bf16.mxu0 %vm1796_vm0, %v1795_v1 }
 0x3b6   : > { %1645 = vmatprep.subr.bf16.mxu0 %v1795_v1 }
 0x3b7   : > { %v1602_v24 = vpop.f32.mrf.mxu0 }
 0x424   : > { %v951_v26 = vpop.f32.mrf.mxu0 }
 0x425   : > { %v957_v27 = vpack.c.bf16 %v951_v26, %v951_v26 }
 0x426   : > { %v1613_v28 = vpop.f32.mrf.mxu0 }
 0x427   : > { %1618 = vmatmul.mubr.msk.bf16.vlgmr.msra.gmra.mxu1 %vm737_vm2, %v957_v27 }
 0x428   : > { %1628 = vmatpush3.bf16.xpose.msra.mxu1 %v1058_v29  ;;  %v954_v30 = vpop.f32.mrf.mxu0  ;;  %1629 = vmatprep.mubr.msk.bf16.mxu1 %vm1796_vm0, %v1795_v1 }
 0x429   : > { %1639 = vmatprep.subr.bf16.mxu1 %v1795_v1 }
 0x42a   : > { %v1614_v31 = vpop.f32.mrf.mxu0 }
 0x42f   : > { %1630 = vmatmul.mubr.msk.bf16.vlgmr.msra.gmra.mxu1 %vm737_vm2, %v1051_v32  ;;  %v1517_v32 = vld [vmem:[%s2176_s12] ss:$0 sm:$0xff] }
 0x430   : > { %1641 = vmatprep.mubr.msk.bf16.mxu1 %vm1796_vm0, %v1795_v1 }
 0x474   : > { %v2076_v33 = vpop.f32.mrf.mxu0 }
 0x476   : > { %v1625_v35 = vpop.f32.mrf.mxu0 }
 0x478   : > { %v1047_v36 = vpop.f32.mrf.mxu0 }
 0x47a   : > { %v1626_v37 = vpop.f32.mrf.mxu0 }
 0x4e7   : > { %v998_v38 = vpop.f32.mrf.mxu1 }
 0x4e9   : > { %v1619_v39 = vpop.f32.mrf.mxu1 }
 0x4eb   : > { %v1001_v40 = vpop.f32.mrf.mxu1 }
 0x4ed   : > { %v1620_v41 = vpop.f32.mrf.mxu1 }
 0x4ef   : > { %v1094_v42 = vpop.f32.mrf.mxu1 }
 0x4f0   : > { %v1095_v43 = vadd.f32 %v1094_v42, %v2024_v34 }
 0x4f1   : > { %v1631_v44 = vpop.f32.mrf.mxu1 }
 0x4f2   : > { %v1100_v45 = vsel %vm737_vm2, %v1095_v43, -inf }
 0x4f3   : > { %1101 = vmax.xlane.f32.xlu1 %v1100_v45  ;;  %v1097_v46 = vpop.f32.mrf.mxu1 }
 0x4f5   : > { %v1632_v47 = vpop.f32.mrf.mxu1 }
 0x57c   : > { %v1102_v48 = vpop.xlane.xlu1 %1101 }
 0x57d   : > { %v1103_v49 = vsub.f32 %v1095_v43, %v1102_v48 }
 0x57f   : > { %v1104_v50 = vmul.f32 1.442695, %v1103_v49 }
 0x581   : > { %1725 = vpow2.f32 %v1104_v50 }
 0x58e   : > { %v1726_v51 = vpop.eup %1725 }
 0x58f   : > { %v1106_v52 = vsel %vm737_vm2, %v1726_v51, 0.0 }
 0x590   : > { %1107 = vadd.xlane.f32.xlu0 %v1106_v52 }
 0x5a6   : > { %1210 = vrot.lane.b32.xlu0 %v1982_v18, %s1799_s30 }
 0x5aa   : > { %1208 = vrot.lane.b32.xlu0 %v1984_v21, %s1799_s30  ;;  %v725_v21 = vld [vmem:[%s2175_s11 + $0x8] sm:$0xf] }
 0x5ab   : > { %v1165_v60 = vsel %vm799_vm4, %v725_v21, 0 }
 0x5ac   : > { %1640 = vmatpush3.bf16.msra.mxu1 %v1165_v60 }
 0x5ad   : > { %1651 = vmatprep.subr.bf16.mxu1 %v1795_v1 }
 0x619   : > { %v1108_v53 = vpop.xlane.xlu0 %1107 }
 0x61a   : > { %1727 = vrcp.f32 %v1108_v53 }
 0x61d   : > { %v1211_v56 = vpop.permute.xlu0 %1210 }
 0x61e   : > { %v1216_v59 = vsel %vm737_vm2, %v1211_v56, 0 }
 0x621   : > { %v1209_v18 = vpop.permute.xlu0 %1208 }
 0x627   : > { %v1728_v54 = vpop.eup %1727 }
 0x628   : > { %v1110_v55 = vmul.f32 %v1728_v54, %v1726_v51 }
 0x62a   : > { %v1111_v57 = vpack.c.bf16 %v1110_v55, %v1110_v55 }
 0x62c   : > { %1636 = vmatmul.mubr.msk.bf16.vlgmr.msra.gmra.mxu0 %vm737_vm2, %v1111_v57 }
 0x62d   : > { %1646 = vmatpush3.bf16.xpose.msra.mxu0 %v1216_v59  ;;  %1647 = vmatprep.mubr.msk.bf16.mxu0 %vm1796_vm0, %v1795_v1 }
 0x62e   : > { %1657 = vmatprep.subr.bf16.mxu0 %v1795_v1 }
 0x634   : > { %1648 = vmatmul.mubr.msk.bf16.vlgmr.msra.gmra.mxu0 %vm737_vm2, %v1209_v18 }
 0x635   : > { %1659 = vmatprep.mubr.msk.bf16.mxu0 %vm1796_vm0, %v1795_v1  ;;  %1658 = vmatpush3.bf16.msra.mxu0 %v1323_v17 }
 0x6ec   : > { %v1154_v61 = vpop.f32.mrf.mxu0 }
 0x6ed   : > { %v1160_v62 = vpack.c.bf16 %v1154_v61, %v1154_v61 }
 0x6ee   : > { %v1637_v63 = vpop.f32.mrf.mxu0 }
 0x6ef   : > { %1642 = vmatmul.mubr.msk.bf16.vlgmr.msra.gmra.mxu1 %vm737_vm2, %v1160_v62 }
 0x6f0   : > { %v1157_v0 = vpop.f32.mrf.mxu0  ;;  %1653 = vmatprep.mubr.msk.bf16.mxu1 %vm1796_vm0, %v1795_v1  ;;  %v1045_v1 = vadd.f32 %v2076_v33, %v998_v38 }
 0x6f2   : > { %v1638_v2 = vpop.f32.mrf.mxu0 }
 0x6f4   : > { %v1252_v3 = vpop.f32.mrf.mxu0 }
 0x6f5   : > { %v1253_v4 = vadd.f32 %v1252_v3, %v2024_v34 }
 0x6f6   : > { %v1649_v5 = vpop.f32.mrf.mxu0 }
 0x6f7   : > { %v1258_v6 = vsel %vm737_vm2, %v1253_v4, -inf }
 0x6f8   : > { %1259 = vmax.xlane.f32.xlu0 %v1258_v6  ;;  %v1255_v7 = vpop.f32.mrf.mxu0 }
 0x6fa   : > { %v1650_v8 = vpop.f32.mrf.mxu0 }
 0x781   : > { %v1260_v9 = vpop.xlane.xlu0 %1259 }
 0x782   : > { %v1261_v10 = vsub.f32 %v1253_v4, %v1260_v9 }
 0x784   : > { %v1262_v11 = vmul.f32 1.442695, %v1261_v10 }
 0x786   : > { %1729 = vpow2.f32 %v1262_v11 }
 0x793   : > { %v1730_v12 = vpop.eup %1729 }
 0x794   : > { %v1264_v13 = vsel %vm737_vm2, %v1730_v12, 0.0 }
 0x795   : > { %1265 = vadd.xlane.f32.xlu1 %v1264_v13 }
 0x7a6   : > { %1270 = vrot.lane.b32.xlu1 %v2034_v58, %s1799_s30 }
 0x7af   : > { %v1201_v34 = vpop.f32.mrf.mxu1 }
 0x7b0   : > { %v1207_v14 = vadd.f32 %v1201_v34, %v1045_v1 }
 0x7b1   : > { %v1643_v15 = vpop.f32.mrf.mxu1 }
 0x7b3   : > { %v1204_v19 = vpop.f32.mrf.mxu1 }
 0x7b5   : > { %v1644_v20 = vpop.f32.mrf.mxu1 }
 0x81e   : > { %v1266_v22 = vpop.xlane.xlu1 %1265 }
 0x81f   : > { %1731 = vrcp.f32 %v1266_v22 }
 0x822   : > { %v1271_v23 = vpop.permute.xlu1 %1270 }
 0x823   : > { %v1276_v58 = vsel %vm799_vm4, %v1271_v23, 0 }
 0x824   : > { %1652 = vmatpush3.bf16.msra.mxu1 %v1276_v58 }
 0x82c   : > { %v1732_v24 = vpop.eup %1731 }
 0x82d   : > { %v1268_v25 = vmul.f32 %v1732_v24, %v1730_v12 }
 0x82f   : > { %v1269_v26 = vpack.c.bf16 %v1268_v25, %v1268_v25 }
 0x831   : > { %1654 = vmatmul.mubr.msk.bf16.vlgmr.msra.gmra.mxu1 %vm737_vm2, %v1269_v26 }
 0x8f1   : > { %v1312_v27 = vpop.f32.mrf.mxu1 }
 0x8f2   : > { %v1318_v28 = vpack.c.bf16 %v1312_v27, %v1312_v27 }
 0x8f3   : > { %v1655_v29 = vpop.f32.mrf.mxu1 }
 0x8f4   : > { %1660 = vmatmul.mubr.msk.bf16.vlgmr.msra.gmra.mxu0 %vm737_vm2, %v1318_v28 }
 0x8f5   : > { %v1315_v30 = vpop.f32.mrf.mxu1 }
 0x8f7   : > { %v1656_v31 = vpop.f32.mrf.mxu1 }
 0x9b4   : > { %v1359_v33 = vpop.f32.mrf.mxu0 }
 0x9b5   : > { %v1365_v35 = vadd.f32 %v1359_v33, %v1207_v14 }
 0x9b6   : > { %v1661_v36 = vpop.f32.mrf.mxu0 }
 0x9b7   : > { %v1372_v37 = vadd.f32 %v1517_v32, %v1365_v35 }
 0x9b8   : > { %v1362_v38 = vpop.f32.mrf.mxu0 }
 0x9b9   : > { %1373 = vst.msk [vmem:[%s468_s19] sm:$0xff] %vm676_vm3, %v1372_v37 }
 0x9ba   : > { %v1662_v39 = vpop.f32.mrf.mxu0 }
 0x9bb   : > { %1746 = shalt.err (!%p1743_p3)
}
 0x9bc   : > { %s1747_s24 = scalar_lea.hbm %s2122_s17, 128  ;;  %s1751_s19 = scalar_lea.hbm %s2177_s13, 256 }
 0x9bd   : > { %p1748_p4 = scmp.ne.s32.totalorder %s2122_s17, %s1747_s24  ;;  %p1752_p9 = scmp.lt.s32.totalorder %s2122_s17, %s2177_s13 }
 0x9be   : > { %p1753_p10 = scmp.lt.s32.totalorder %s1751_s19, %s1747_s24 }
 0x9bf   : > { %p1749_p7 = pnand %p1748_p4, %p1909_p5 }
 0x9c0   : > { %p1754_p11 = por %p1753_p10, %p1752_p9 }
 0x9c1   : > { %p1750_p8 = pneg %p1749_p7 }
 0x9c3   : > { %p1755_p12 = pnand %p1754_p11, %p1750_p8 }
 0x9c5   : > { %1758 = shalt.err (!%p1755_p12)
}
 0x9c6   : > { %1663 = dma.vmem_to_hbm [thread:$0]  (%p1909_p5), %s2124_s27, 128, %s2122_s17, %s1375_s29  }
 0x9c7 PF: > { %p1669_p13 = scmp.ge.s32.totalorder %s1793_s28, 2  ;;  %s1400_s21 = sand.u32 1, %s1781_s25  }
 0x9c8   : > { %s1401_s22 = scalar_lea.sflag [#allocation3], %s1400_s21 }
 0x9c9   : > { %p1666_p0 = pnand %p1669_p13, %p1913_p6 }
 0x9cb   : > { %p1667_p1 = pneg %p1666_p0 }
 0x9cd   : > { %1776 = dma.done.wait (%p1667_p1), %s1401_s22, 128  }
 0x9ce   : > { %1778 = vsyncadd (%p1667_p1), %s1401_s22, 4294967168  ;;  %s2189_s28 = sld [smem:[#allocation6_spill]]  ;;  %s2192_s25 = smov %s1785_s26 }
 0x9cf   : > { %s2190_s23 = sld [smem:[#allocation5_spill]] }
 0x9d0   : > { %s2191_s27 = sld [smem:[#allocation7_spill]] }
 0x9d4   : > { %p23_p2 = scmp.ge.s32.totalorder %s2189_s28, 4  }
 0x9d5   : > { %s2193_s26 = smov %s2190_s23 }
 0x9d6   :  { %25 = sbr.rel (!%p23_p2) target bundleno = 3 (0x3), region = 116 }
 0x9db   :  { %1406 = vsyncpa [#allocation3], 1 }
 0x9dc   :  { %1408 = vsyncpa [#allocation3 + $0x1], 1 }

</bundles_post_ra>
